<compile_context>
chip_gen: v7x
topology: tpu7x:2x2x1
jax: 0.10.0
libtpu: 0.0.40
codegen_flags: <defaults>
</compile_context>

<pallas_src>
import math

import jax
import jax.numpy as jnp
from jax.experimental import pallas as pl
from jax.experimental.pallas import tpu as pltpu

LANES = 128  # TPU lane width; hidden/action dims are zero-padded to this.


def _round_up(n, m):
    return (n + m - 1) // m * m


def _make_kernel(sp, hp):
    """Build the fused MLP kernel for a given padded state dim (sp) / hidden pad (hp)."""
    bias_row = sp
    w2_row = sp + 8
    w3_row = sp + 8 + hp

    def kernel(x_ref, p_ref, o_ref):
        x = x_ref[...]                               # (TB, sp)
        w1 = p_ref[0:sp, :]                          # (sp, 128)
        b1 = p_ref[bias_row:bias_row + 1, :]         # (1, 128)
        b2 = p_ref[bias_row + 1:bias_row + 2, :]
        b3 = p_ref[bias_row + 2:bias_row + 3, :]
        w2 = p_ref[w2_row:w2_row + hp, :]            # (128, 128)
        w3 = p_ref[w3_row:w3_row + hp, :]            # (128, 128)

        h1 = jnp.dot(x, w1, preferred_element_type=jnp.float32) + b1
        h1 = jnp.maximum(h1, 0.0)
        h2 = jnp.dot(h1, w2, preferred_element_type=jnp.float32) + b2
        h2 = jnp.maximum(h2, 0.0)
        o_ref[...] = (jnp.dot(h2, w3, preferred_element_type=jnp.float32)
                      + b3).astype(o_ref.dtype)

    return kernel


def _pack_params(params, hidden, action_size, sp, hp):
    """Pack W1|biases|W2|W3 into one lane-dense (sp + 8 + 2*hp, 128) f32 slab."""
    def pad2(a, rows, cols):
        a = a.astype(jnp.float32)
        return jnp.pad(a, ((0, rows - a.shape[0]), (0, cols - a.shape[1])))

    w1 = pad2(params["w1"], sp, LANES)
    bias = jnp.zeros((8, LANES), jnp.float32)
    bias = bias.at[0, :hidden].set(params["b1"].reshape(-1))
    bias = bias.at[1, :hidden].set(params["b2"].reshape(-1))
    bias = bias.at[2, :action_size].set(params["b3"].reshape(-1))
    w2 = pad2(params["w2"], hp, LANES)
    w3 = pad2(params["w3"], hp, LANES)
    return jnp.concatenate([w1, bias, w2, w3], axis=0)


def qnetwork_forward(x, params, *, block_b=256):
    """x: (B, state_dim) float32. params: (in,out)-layout weights + (1,out) biases."""
    B, state_dim = x.shape
    hidden = params["w1"].shape[1]
    action_size = params["w3"].shape[1]
    assert state_dim <= LANES and hidden <= LANES and action_size <= LANES

    sp = _round_up(max(state_dim, 8), 8)   # padded state dim (sublane aligned)
    hp = LANES                             # hidden / action dims padded to full lanes

    tb = min(_round_up(block_b, 8), _round_up(B, 8))   # batch rows per grid step
    bp = _round_up(B, tb)                               # padded batch

    xp = jnp.pad(x.astype(jnp.float32), ((0, bp - B), (0, sp - state_dim)))
    slab = _pack_params(params, hidden, action_size, sp, hp)
    n_param_rows = sp + 8 + 2 * hp

    out = pl.pallas_call(
        _make_kernel(sp, hp),
        out_shape=jax.ShapeDtypeStruct((bp, LANES), jnp.float32),
        grid_spec=pltpu.PrefetchScalarGridSpec(
            num_scalar_prefetch=0,
            grid=(bp // tb,),
            in_specs=[
                pl.BlockSpec((tb, sp), lambda i: (i, 0)),               # streamed x
                pl.BlockSpec((n_param_rows, LANES), lambda i: (0, 0)),  # resident params
            ],
            out_specs=pl.BlockSpec((tb, LANES), lambda i: (i, 0)),      # lane-dense out
        ),
        compiler_params=pltpu.CompilerParams(
            dimension_semantics=("parallel",),  # shard batch blocks across TCs (v7x)
        ),
    )(xp, slab)
    return out[:B, :action_size]


def init_params(key, state_dim, hidden, action_size):
    """Deterministic init mimicking torch.nn.Linear (uniform +/- 1/sqrt(fan_in))."""
    def linear(k, fan_in, fan_out):
        kw, kb = jax.random.split(k)
        bound = 1.0 / math.sqrt(fan_in)
        w = jax.random.uniform(kw, (fan_in, fan_out), jnp.float32, -bound, bound)
        b = jax.random.uniform(kb, (1, fan_out), jnp.float32, -bound, bound)
        return w, b

    k1, k2, k3 = jax.random.split(key, 3)
    w1, b1 = linear(k1, state_dim, hidden)
    w2, b2 = linear(k2, hidden, hidden)
    w3, b3 = linear(k3, hidden, action_size)
    return {"w1": w1, "b1": b1, "w2": w2, "b2": b2, "w3": w3, "b3": b3}


def qnetwork_ref(x, p):
    h1 = jnp.maximum(x @ p["w1"] + p["b1"], 0.0)
    h2 = jnp.maximum(h1 @ p["w2"] + p["b2"], 0.0)
    return h2 @ p["w3"] + p["b3"]


if __name__ == "__main__":
    # Small shapes implied by the module: state_size=(8,), hidden=32, action_size=4.
    B, STATE_DIM, HIDDEN, ACTIONS = 8, 8, 32, 4

    key = jax.random.PRNGKey(0)
    k_params, k_x, k_x2 = jax.random.split(key, 3)
    params = init_params(k_params, STATE_DIM, HIDDEN, ACTIONS)

    # Small (acting-path) batch: single grid step.
    x = jax.random.normal(k_x, (B, STATE_DIM), jnp.float32)
    out = jax.block_until_ready(qnetwork_forward(x, params))
    ref = qnetwork_ref(x, params)
    assert out.shape == (B, ACTIONS)
    assert jnp.allclose(out, ref, atol=1e-4, rtol=1e-4), "mismatch vs pure-JAX reference"

    # Larger ragged batch: exercises the multi-block grid + batch padding path.
    xb = jax.random.normal(k_x2, (300, STATE_DIM), jnp.float32)
    outb = jax.block_until_ready(qnetwork_forward(xb, params, block_b=128))
    refb = qnetwork_ref(xb, params)
    assert outb.shape == (300, ACTIONS)
    assert jnp.allclose(outb, refb, atol=1e-4, rtol=1e-4), "mismatch vs pure-JAX reference (batched)"

    print("KERNEL_OK")
</pallas_src>

<mosaic_0001>
module attributes {stable_mosaic.version = 11 : i64} {
  func.func @kernel(%arg0: i32, %arg1: memref<8x8xf32, #tpu.memory_space<vmem>>, %arg2: memref<272x128xf32, #tpu.memory_space<vmem>>, %arg3: memref<8x128xf32, #tpu.memory_space<vmem>>) attributes {dimension_semantics = [#tpu.dimension_semantics<parallel>], iteration_bounds = array<i64: 1>, scalar_prefetch = 0 : i64, scratch_operands = 0 : i64, tpu.core_type = #tpu.core_type<tc>, window_params = [{transform_indices = @transform_0, window_bounds = array<i64: 8, 8>}, {pipeline_mode = #tpu.pipeline_mode<synchronous>, transform_indices = @transform_1, window_bounds = array<i64: 272, 128>}, {transform_indices = @transform_2, window_bounds = array<i64: 8, 128>}]} {
    %c0 = arith.constant 0 : index
    %c0_0 = arith.constant 0 : index
    %0 = vector.load %arg1[%c0, %c0_0] : memref<8x8xf32, #tpu.memory_space<vmem>>, vector<8x8xf32>
    %c0_1 = arith.constant 0 : index
    %c0_2 = arith.constant 0 : index
    %1 = vector.load %arg2[%c0_1, %c0_2] : memref<272x128xf32, #tpu.memory_space<vmem>>, vector<8x128xf32>
    %c8 = arith.constant 8 : index
    %c0_3 = arith.constant 0 : index
    %2 = vector.load %arg2[%c8, %c0_3] : memref<272x128xf32, #tpu.memory_space<vmem>>, vector<1x128xf32>
    %c9 = arith.constant 9 : index
    %c0_4 = arith.constant 0 : index
    %3 = vector.load %arg2[%c9, %c0_4] : memref<272x128xf32, #tpu.memory_space<vmem>>, vector<1x128xf32>
    %c10 = arith.constant 10 : index
    %c0_5 = arith.constant 0 : index
    %4 = vector.load %arg2[%c10, %c0_5] : memref<272x128xf32, #tpu.memory_space<vmem>>, vector<1x128xf32>
    %c16 = arith.constant 16 : index
    %c0_6 = arith.constant 0 : index
    %5 = vector.load %arg2[%c16, %c0_6] : memref<272x128xf32, #tpu.memory_space<vmem>>, vector<128x128xf32>
    %c144 = arith.constant 144 : index
    %c0_7 = arith.constant 0 : index
    %6 = vector.load %arg2[%c144, %c0_7] : memref<272x128xf32, #tpu.memory_space<vmem>>, vector<128x128xf32>
    %cst = arith.constant dense<0.000000e+00> : vector<8x128xf32>
    %7 = tpu.matmul %0, %1, %cst {dimension_numbers = #tpu.dot_dimension_numbers<[1], [0], [0], [1], [0, 0, 1, 1], [], []>} : vector<8x8xf32>, vector<8x128xf32>, vector<8x128xf32> -> vector<8x128xf32>
    %8 = vector.broadcast %2 : vector<1x128xf32> to vector<8x128xf32>
    %9 = arith.addf %7, %8 : vector<8x128xf32>
    %cst_8 = arith.constant 0.000000e+00 : f32
    %10 = vector.broadcast %cst_8 : f32 to vector<8x128xf32>
    %11 = arith.maximumf %9, %10 : vector<8x128xf32>
    %cst_9 = arith.constant dense<0.000000e+00> : vector<8x128xf32>
    %12 = tpu.matmul %11, %5, %cst_9 {dimension_numbers = #tpu.dot_dimension_numbers<[1], [0], [0], [1], [0, 0, 1, 1], [], []>} : vector<8x128xf32>, vector<128x128xf32>, vector<8x128xf32> -> vector<8x128xf32>
    %13 = vector.broadcast %3 : vector<1x128xf32> to vector<8x128xf32>
    %14 = arith.addf %12, %13 : vector<8x128xf32>
    %cst_10 = arith.constant 0.000000e+00 : f32
    %15 = vector.broadcast %cst_10 : f32 to vector<8x128xf32>
    %16 = arith.maximumf %14, %15 : vector<8x128xf32>
    %cst_11 = arith.constant dense<0.000000e+00> : vector<8x128xf32>
    %17 = tpu.matmul %16, %6, %cst_11 {dimension_numbers = #tpu.dot_dimension_numbers<[1], [0], [0], [1], [0, 0, 1, 1], [], []>} : vector<8x128xf32>, vector<128x128xf32>, vector<8x128xf32> -> vector<8x128xf32>
    %18 = vector.broadcast %4 : vector<1x128xf32> to vector<8x128xf32>
    %19 = arith.addf %17, %18 : vector<8x128xf32>
    %c0_12 = arith.constant 0 : index
    %c0_13 = arith.constant 0 : index
    %20 = vector.load %arg3[%c0_12, %c0_13] : memref<8x128xf32, #tpu.memory_space<vmem>>, vector<8x128xf32>
    tpu.vector_store %arg3[%c0_12, %c0_13], %19 {strides = array<i32>} : memref<8x128xf32, #tpu.memory_space<vmem>>, vector<8x128xf32>,
    return
  }
  func.func @transform_0(%arg0: i32) -> (i32, i32) {
    %c0_i32 = arith.constant 0 : i32
    %c0_i32_0 = arith.constant 0 : i32
    return %arg0, %c0_i32 : i32, i32
  }
  func.func @transform_1(%arg0: i32) -> (i32, i32) {
    %c0_i32 = arith.constant 0 : i32
    %c0_i32_0 = arith.constant 0 : i32
    %c0_i32_1 = arith.constant 0 : i32
    return %c0_i32, %c0_i32_0 : i32, i32
  }
  func.func @transform_2(%arg0: i32) -> (i32, i32) {
    %c0_i32 = arith.constant 0 : i32
    %c0_i32_0 = arith.constant 0 : i32
    return %arg0, %c0_i32 : i32, i32
  }
}

</mosaic_0001>

<bundles_post_ra>
// kernel: tpu_custom_call.1
= control target key start
LH: loop header
LB: loop body
LE: loop exit
PB: predicated region body
PF: predicated region fallthrough
CT: control target
= control target key end

     0   :  { %7 = vsyncpa [#allocation3], 0  ;;  %s648_s0 = inlined_call_operand.hbm [shape: f32[8,8], index: 0, kind: input, shape index: {}]   ;;  %s649_s1 = inlined_call_operand.hbm [shape: f32[272,128], index: 1, kind: input, shape index: {}]   ;;  %s650_s2 = inlined_call_operand.hbm [shape: f32[8,128], index: 2, kind: output, shape index: {}]  }
   0x1   :  { %8 = vsyncpa [#allocation6], 0 }
   0x2   :  { %9 = vsyncpa [#allocation4], 0  ;;  %s563_s9 = smov [#allocation2]   ;;  %s564_s11 = smov [#allocation5]  }
   0x3   :  { %s16_s10 = sshll.u32 %s563_s9, 4  ;;  %s25_s12 = sshll.u32 %s564_s11, 4  ;;  %s17_s10 = int_to_ptr.vmem [resolvable:$true] %s16_s10  ;;  %s586_s12 = int_to_ptr.vmem [resolvable:$true] %s25_s12 }
   0x4   :  { %s491_s15 = scalar_lea.hbm %s648_s0, 128 }
   0x5   :  { %p492_p0 = scmp.ne.s32.totalorder %s648_s0, %s491_s15  ;;  %p495_p1 = scmp.lt.u32.totalorder %s491_s15, %s648_s0 }
   0x7   :  { %p497_p2 = pnand %p495_p1, %p492_p0 }
   0x9   :  { %500 = shalt.err (!%p497_p2)
}
   0xa   :  { %s501_s20 = scalar_lea.vmem %s17_s10, 128  ;;  %p506_p4 = scmp.lt.s32.totalorder %s17_s10, %s17_s10 }
   0xb   :  { %p502_p3 = scmp.ne.s32.totalorder %s17_s10, %s501_s20  ;;  %p507_p5 = scmp.lt.s32.totalorder %s501_s20, %s501_s20 }
   0xd   :  { %p508_p6 = por %p507_p5, %p506_p4 }
   0xf   :  { %p509_p7 = pnand %p508_p6, %p502_p3 }
  0x11   :  { %512 = shalt.err (!%p509_p7)
}
  0x12   :  { %19 = dma.hbm_to_vmem [thread:$0]  %s648_s0, 128, %s17_s10, [#allocation3]  }
  0x13   :  { %s513_s25 = scalar_lea.hbm %s649_s1, 4352 }
  0x14   :  { %p514_p8 = scmp.ne.s32.totalorder %s649_s1, %s513_s25  ;;  %p517_p9 = scmp.lt.u32.totalorder %s513_s25, %s649_s1 }
  0x16   :  { %p519_p10 = pnand %p517_p9, %p514_p8 }
  0x18   :  { %522 = shalt.err (!%p519_p10)
}
  0x19   :  { %s523_s30 = scalar_lea.vmem %s586_s12, 4352  ;;  %p528_p12 = scmp.lt.s32.totalorder %s586_s12, %s586_s12 }
  0x1a   :  { %p524_p11 = scmp.ne.s32.totalorder %s586_s12, %s523_s30  ;;  %p529_p13 = scmp.lt.s32.totalorder %s523_s30, %s523_s30 }
  0x1c   :  { %p530_p0 = por %p529_p13, %p528_p12 }
  0x1e   :  { %p531_p1 = pnand %p530_p0, %p524_p11 }
  0x20   :  { %534 = shalt.err (!%p531_p1)
}
  0x21   :  { %s565_s0 = smov 128   ;;  %s566_s3 = smov 8  }
  0x22   :  { %31 = dma.hbm_to_vmem [thread:$0]  %s649_s1, 4352, %s586_s12, [#allocation6], %s565_s0, %s565_s0, %s566_s3  }
  0x23   :  { %557 = dma.done.wait [#allocation3], 128  }
  0x24   :  { %558 = vsyncadd [#allocation3], 4294967168 }
  0x25   :  { %559 = dma.done.wait [#allocation6], 4352  }
  0x26   :  { %560 = vsyncadd [#allocation6], 4294962944  ;;  %v567_v0 = vmov 0.0   ;;  %vm568_vm0 = vmmov 0   ;;  %v569_v1 = vmov 0.0|0.0   ;;  %vm79_vm1 = vcmask 64512  }
  0x27   :  { %360 = vmatprep.subr.mxu0 %v567_v0  ;;  %362 = vmatprep.mubr.msk.f32.mxu0 %vm568_vm0, %v567_v0  ;;  %v39_v2 = vld [vmem:[#allocation5] sm:$0xff]  ;;  %v38_v3 = vld [vmem:[#allocation2] sm:$0xff]  ;;  %v43_v4 = vld [vmem:[#allocation5 + $0x10] sm:$0xff]  ;;  %s570_s1 = smov [#allocation7]  }
  0x28   :  { %435 = vmatprep.subr.bf16.mxu1 %v569_v1  ;;  %397 = vmatprep.mubr.msk.f32.mxu1 %vm568_vm0, %v567_v0  ;;  %v44_v5 = vld [vmem:[#allocation5 + $0x18] sm:$0xff]  ;;  %v45_v6 = vld [vmem:[#allocation5 + $0x20] sm:$0xff]  ;;  %v46_v7 = vld [vmem:[#allocation5 + $0x28] sm:$0xff]  ;;  %s310_s6 = sshll.u32 %s570_s1, 4  ;;  %s311_s6 = int_to_ptr.vmem [resolvable:$true] %s310_s6 }
  0x29   :  { %361 = vmatpush3.msra.mxu0 %v39_v2  ;;  %v436_v8 = vpack.c.bf16 %v44_v5, %v43_v4  ;;  %v439_v9 = vpack.c.bf16 %v46_v7, %v45_v6  ;;  %v47_v10 = vld [vmem:[#allocation5 + $0x30] sm:$0xff]  ;;  %v48_v11 = vld [vmem:[#allocation5 + $0x38] sm:$0xff]  ;;  %v49_v13 = vld [vmem:[#allocation5 + $0x40] sm:$0xff]  ;;  %s535_s7 = scalar_lea.vmem %s311_s6, 128  ;;  %p540_p3 = scmp.lt.s32.totalorder %s311_s6, %s311_s6 }
  0x2a   :  { %363 = vmatmul.mubr.msk.f32.vlgmr.msra.gmra.mrb[0].mxu0 %vm79_vm1, %v38_v3  ;;  %459 = vmatprep.subr.bf16.mxu0 %v569_v1  ;;  %v442_v12 = vpack.c.bf16 %v48_v11, %v47_v10  ;;  %v50_v14 = vld [vmem:[#allocation5 + $0x48] sm:$0xff]  ;;  %v51_v16 = vld [vmem:[#allocation5 + $0x50] sm:$0xff]  ;;  %v52_v17 = vld [vmem:[#allocation5 + $0x58] sm:$0xff]  ;;  %p536_p2 = scmp.ne.s32.totalorder %s311_s6, %s535_s7  ;;  %p541_p4 = scmp.lt.s32.totalorder %s535_s7, %s535_s7 }
  0x2b   :  { %432 = vmatprep.mubr.msk.f32.mxu0 %vm568_vm0, %v567_v0  ;;  %437 = vmatpush3.bf16.msra.mxu1 %v436_v8  ;;  %v445_v15 = vpack.c.bf16 %v50_v14, %v49_v13  ;;  %v448_v18 = vpack.c.bf16 %v52_v17, %v51_v16  ;;  %v53_v19 = vld [vmem:[#allocation5 + $0x60] sm:$0xff]  ;;  %v54_v20 = vld [vmem:[#allocation5 + $0x68] sm:$0xff]  ;;  %v55_v22 = vld [vmem:[#allocation5 + $0x70] sm:$0xff] }
  0x2c   :  { %438 = vmatprep.subr.bf16.mxu1 %v569_v1  ;;  %v451_v21 = vpack.c.bf16 %v54_v20, %v53_v19  ;;  %v56_v23 = vld [vmem:[#allocation5 + $0x78] sm:$0xff]  ;;  %v57_v25 = vld [vmem:[#allocation5 + $0x80] sm:$0xff]  ;;  %v58_v26 = vld [vmem:[#allocation5 + $0x88] sm:$0xff]  ;;  %p542_p5 = por %p541_p4, %p540_p3 }
  0x2d   :  { %v454_v24 = vpack.c.bf16 %v56_v23, %v55_v22  ;;  %v457_v27 = vpack.c.bf16 %v58_v26, %v57_v25  ;;  %v59_v28 = vld [vmem:[#allocation5 + $0x90] sm:$0xff]  ;;  %v60_v29 = vld [vmem:[#allocation5 + $0x98] sm:$0xff]  ;;  %v61_v30 = vld [vmem:[#allocation5 + $0xa0] sm:$0xff] }
  0x2e   :  { %v460_v31 = vpack.c.bf16 %v60_v29, %v59_v28  ;;  %v62_v32 = vld [vmem:[#allocation5 + $0xa8] sm:$0xff]  ;;  %v63_v34 = vld [vmem:[#allocation5 + $0xb0] sm:$0xff]  ;;  %v64_v35 = vld [vmem:[#allocation5 + $0xb8] sm:$0xff]  ;;  %p543_p6 = pnand %p542_p5, %p536_p2 }
  0x2f   :  { %440 = vmatpush3.bf16.msra.mxu1 %v439_v9  ;;  %v463_v33 = vpack.c.bf16 %v62_v32, %v61_v30  ;;  %v466_v36 = vpack.c.bf16 %v64_v35, %v63_v34  ;;  %v65_v37 = vld [vmem:[#allocation5 + $0xc0] sm:$0xff]  ;;  %v66_v38 = vld [vmem:[#allocation5 + $0xc8] sm:$0xff]  ;;  %v67_v40 = vld [vmem:[#allocation5 + $0xd0] sm:$0xff] }
  0x30   :  { %441 = vmatprep.subr.bf16.mxu1 %v569_v1  ;;  %461 = vmatpush3.bf16.msra.mxu0 %v460_v31  ;;  %v469_v39 = vpack.c.bf16 %v66_v38, %v65_v37  ;;  %v68_v41 = vld [vmem:[#allocation5 + $0xd8] sm:$0xff]  ;;  %v69_v43 = vld [vmem:[#allocation5 + $0xe0] sm:$0xff]  ;;  %v70_v44 = vld [vmem:[#allocation5 + $0xe8] sm:$0xff] }
  0x31   :  { %462 = vmatprep.subr.bf16.mxu0 %v569_v1  ;;  %v472_v42 = vpack.c.bf16 %v68_v41, %v67_v40  ;;  %v475_v45 = vpack.c.bf16 %v70_v44, %v69_v43  ;;  %v71_v46 = vld [vmem:[#allocation5 + $0xf0] sm:$0xff]  ;;  %v72_v47 = vld [vmem:[#allocation5 + $0xf8] sm:$0xff]  ;;  %v320_v49 = vld [vmem:[#allocation5 + $0x8] ss:$0 sm:$0xff] }
  0x32   :  { %v478_v48 = vpack.c.bf16 %v72_v47, %v71_v46  ;;  %v73_v54 = vld [vmem:[#allocation5 + $0x100] sm:$0xff]  ;;  %v74_v55 = vld [vmem:[#allocation5 + $0x108] sm:$0xff] }
  0x33   :  { %443 = vmatpush3.bf16.msra.mxu1 %v442_v12  ;;  %v481_v56 = vpack.c.bf16 %v74_v55, %v73_v54  ;;  %v322_v57 = vld [vmem:[#allocation5 + $0x9] ss:$0 sm:$0xff]  ;;  %v323_v62 = vld [vmem:[#allocation5 + $0xa] ss:$0 sm:$0xff] }
  0x34   :  { %444 = vmatprep.subr.bf16.mxu1 %v569_v1  ;;  %464 = vmatpush3.bf16.msra.mxu0 %v463_v33 }
  0x35   :  { %465 = vmatprep.subr.bf16.mxu0 %v569_v1 }
  0x37   :  { %446 = vmatpush3.bf16.msra.mxu1 %v445_v15 }
  0x38   :  { %447 = vmatprep.subr.bf16.mxu1 %v569_v1  ;;  %467 = vmatpush3.bf16.msra.mxu0 %v466_v36 }
  0x39   :  { %468 = vmatprep.subr.bf16.mxu0 %v569_v1 }
  0x3b   :  { %449 = vmatpush3.bf16.msra.mxu1 %v448_v18 }
  0x3c   :  { %450 = vmatprep.subr.bf16.mxu1 %v569_v1  ;;  %470 = vmatpush3.bf16.msra.mxu0 %v469_v39 }
  0x3d   :  { %471 = vmatprep.subr.bf16.mxu0 %v569_v1 }
  0x3f   :  { %452 = vmatpush3.bf16.msra.mxu1 %v451_v21 }
  0x40   :  { %453 = vmatprep.subr.bf16.mxu1 %v569_v1  ;;  %473 = vmatpush3.bf16.msra.mxu0 %v472_v42 }
  0x41   :  { %474 = vmatprep.subr.bf16.mxu0 %v569_v1 }
  0x43   :  { %455 = vmatpush3.bf16.msra.mxu1 %v454_v24 }
  0x44   :  { %456 = vmatprep.subr.bf16.mxu1 %v569_v1  ;;  %476 = vmatpush3.bf16.msra.mxu0 %v475_v45 }
  0x45   :  { %477 = vmatprep.subr.bf16.mxu0 %v569_v1 }
  0x47   :  { %458 = vmatpush3.bf16.msra.mxu1 %v457_v27 }
  0x48   :  { %479 = vmatpush3.bf16.msra.mxu0 %v478_v48 }
  0x49   :  { %480 = vmatprep.subr.bf16.mxu0 %v569_v1 }
  0x4c   :  { %482 = vmatpush3.bf16.msra.mxu0 %v481_v56 }
  0xfd   :  { %v149_v50 = vpop.f32.mrb[0].mxu0 }
  0xfe   :  { %v150_v51 = vadd.f32 %v320_v49, %v149_v50  ;;  %v364_v52 = vpop.f32.mrb[1].mxu0 }
 0x100   :  { %v153_v53 = vmax.f32 %v150_v51, 0.0 }
 0x102   :  { %398 = vmatmul.mubr.f32.vlgmr.msra.gmra.mrb[0].mxu1 %v153_v53 }
 0x1d5   :  { %v224_v58 = vpop.f32.mrb[0].mxu1 }
 0x1d6   :  { %v225_v59 = vadd.f32 %v322_v57, %v224_v58  ;;  %v399_v60 = vpop.f32.mrb[1].mxu1 }
 0x1d8   :  { %v228_v61 = vmax.f32 %v225_v59, 0.0 }
 0x1da   :  { %433 = vmatmul.mubr.f32.vlgmr.msra.gmra.mrb[2].mxu0 %v228_v61 }
 0x2ad   :  { %v299_v63 = vpop.f32.mrb[2].mxu0 }
 0x2ae   :  { %v300_v0 = vadd.f32 %v323_v62, %v299_v63  ;;  %v434_v1 = vpop.f32.mrb[3].mxu0 }
 0x2b0   :  { %303 = vst [vmem:[#allocation7] sm:$0xff] %v300_v0 }
 0x2b1   :  { %546 = shalt.err (!%p543_p6)
}
 0x2b2   :  { %s547_s10 = scalar_lea.hbm %s650_s2, 128 }
 0x2b3   :  { %p548_p7 = scmp.ne.s32.totalorder %s650_s2, %s547_s10  ;;  %p551_p8 = scmp.lt.u32.totalorder %s547_s10, %s650_s2 }
 0x2b5   :  { %p553_p9 = pnand %p551_p8, %p548_p7 }
 0x2b7   :  { %556 = shalt.err (!%p553_p9)
}
 0x2b8   :  { %313 = dma.vmem_to_hbm [thread:$0]  %s311_s6, 128, %s650_s2, [#allocation4]  }
 0x2b9   :  { %561 = dma.done.wait [#allocation4], 128  }
 0x2ba   :  { %562 = vsyncadd [#allocation4], 4294967168 }
 0x2bb   :  { %317 = vsyncpa [#allocation3], 1 }
 0x2bc   :  { %318 = vsyncpa [#allocation6], 1 }
 0x2bd   :  { %319 = vsyncpa [#allocation4], 1 }

</bundles_post_ra>
